<compile_context>
chip_gen: v7x
topology: tpu7x:2x2x1
jax: 0.10.0
libtpu: 0.0.40
codegen_flags: <defaults>
</compile_context>

<pallas_src>
import functools

import jax
import jax.numpy as jnp
from jax.experimental import pallas as pl
from jax.experimental.pallas import tpu as pltpu


_VMEM_BUDGET_BYTES = 20 * 1024 * 1024      # padded, double-buffered working-set budget
_VMEM_LIMIT_BYTES = 32 * 1024 * 1024       # scoped VMEM limit (raises v5e's 16 MiB default)
_MIN_PIXELS_FOR_TWO_TILES = 2 * 128 * 128  # prefer >= 2 tiles above this (v7x 2 TCs)


def _round_up(x, m):
    return (int(x) + m - 1) // m * m


def _pad8(x):
    return _round_up(max(int(x), 1), 8)


def _peekaboo_kernel(bg_ref, a_ref, fg_ref, img_ref, *maybe_alpha_ref,
                     apply_sigmoid, num_labels, num_channels):
    # bg_ref : VMEM (C, 1)     flat background color (constant index map -> fetched once)
    # a_ref  : VMEM (L, tn)    alpha logits (or alphas) for this spatial tile
    # fg_ref : VMEM (C, tn)    foreground tile
    # img_ref: VMEM (L*C, tn)  blended images, (L, C) flattened -> sublane-packed output
    # maybe_alpha_ref: optional VMEM (L, tn) alphas output
    a = a_ref[...]
    alphas = jax.nn.sigmoid(a) if apply_sigmoid else a            # (L, tn), once per tile
    if maybe_alpha_ref:
        maybe_alpha_ref[0][...] = alphas.astype(maybe_alpha_ref[0].dtype)

    bg = bg_ref[...]                                              # (C, 1)
    fg = fg_ref[...]                                              # (C, tn), read once
    fg_minus_bg = fg - bg                                         # (C, tn)

    for l in range(num_labels):                                   # static unroll, L small
        alpha_l = alphas[l:l + 1, :]                              # (1, tn) sublane bcast
        # img = bg + alpha * (fg - bg)  -> one vmul per element
        img_l = bg + alpha_l * fg_minus_bg                        # (C, tn)
        img_ref[pl.ds(l * num_channels, num_channels), :] = img_l.astype(img_ref.dtype)


def _pick_spatial_tile(n_pixels, num_labels, num_channels, write_alphas, out_itemsize):
    """Largest 128-multiple lane tile whose (8,128)-padded, double-buffered VMEM
    working set fits the budget; never exceeds round_up(n_pixels, 128)."""
    bytes_per_col = 4 * (_pad8(num_labels) + _pad8(num_channels))         # a + fg (f32)
    bytes_per_col += out_itemsize * _pad8(num_labels * num_channels)      # images out
    if write_alphas:
        bytes_per_col += 4 * _pad8(num_labels)                            # alphas out
    bytes_per_col *= 2                                                    # double buffer
    tn = max(128, (_VMEM_BUDGET_BYTES // bytes_per_col) // 128 * 128)
    tn = min(tn, _round_up(n_pixels, 128))
    if n_pixels >= _MIN_PIXELS_FOR_TWO_TILES:
        # >= 2 tiles: DMA/compute overlap + v7x two-TensorCore sharding of the grid.
        tn = min(tn, _round_up(-(-n_pixels // 2), 128))
    return tn


@functools.partial(jax.jit,
                   static_argnames=("apply_sigmoid", "write_alphas", "out_dtype"))
def peekaboo_blend(alphas_or_logits, foreground, background_color, *,
                   apply_sigmoid, write_alphas, out_dtype=None):
    """alphas_or_logits: (L, H, W); foreground: (C, H, W); background_color: (C,).

    Returns (images (L, C, H, W), alphas (L, H, W) or None)."""
    L, H, W = alphas_or_logits.shape
    C = foreground.shape[0]
    assert foreground.shape == (C, H, W)
    out_dtype = jnp.dtype(foreground.dtype if out_dtype is None else out_dtype)

    N = H * W
    tn = _pick_spatial_tile(N, L, C, write_alphas, out_dtype.itemsize)
    grid_n = -(-N // tn)
    if grid_n > 1 and grid_n % 2 == 1:            # prefer an even tile count (v7x 2 TCs)
        new_tn = _round_up(-(-N // (grid_n + 1)), 128)
        new_grid = -(-N // new_tn)
        if new_grid % 2 == 0:
            tn, grid_n = new_tn, new_grid
    n_pad = grid_n * tn

    a_flat = alphas_or_logits.reshape(L, N).astype(jnp.float32)
    fg_flat = foreground.reshape(C, N).astype(jnp.float32)
    if n_pad != N:
        a_flat = jnp.pad(a_flat, ((0, 0), (0, n_pad - N)))
        fg_flat = jnp.pad(fg_flat, ((0, 0), (0, n_pad - N)))
    bg_col = jnp.asarray(background_color, dtype=jnp.float32).reshape(C, 1)

    kernel = functools.partial(_peekaboo_kernel, apply_sigmoid=apply_sigmoid,
                               num_labels=L, num_channels=C)

    img_spec = pl.BlockSpec((L * C, tn), lambda j: (0, j))        # lane/sublane dense
    if write_alphas:
        out_shape = (jax.ShapeDtypeStruct((L * C, n_pad), out_dtype),
                     jax.ShapeDtypeStruct((L, n_pad), jnp.float32))
        out_specs = [img_spec, pl.BlockSpec((L, tn), lambda j: (0, j))]
    else:
        out_shape = jax.ShapeDtypeStruct((L * C, n_pad), out_dtype)
        out_specs = img_spec

    grid_spec = pltpu.PrefetchScalarGridSpec(
        num_scalar_prefetch=0,
        grid=(grid_n,),
        in_specs=[
            pl.BlockSpec((C, 1), lambda j: (0, 0)),               # flat bg color
            pl.BlockSpec((L, tn), lambda j: (0, j)),              # alpha logits / alphas
            pl.BlockSpec((C, tn), lambda j: (0, j)),              # foreground (once/tile)
        ],
        out_specs=out_specs,
    )

    outs = pl.pallas_call(
        kernel,
        out_shape=out_shape,
        grid_spec=grid_spec,
        compiler_params=pltpu.CompilerParams(
            dimension_semantics=("parallel",),
            vmem_limit_bytes=_VMEM_LIMIT_BYTES,
        ),
    )(bg_col, a_flat, fg_flat)

    if write_alphas:
        images_flat, alphas_flat = outs
    else:
        images_flat, alphas_flat = outs, None

    if n_pad != N:
        images_flat = images_flat[:, :N]
        if alphas_flat is not None:
            alphas_flat = alphas_flat[:, :N]

    images = images_flat.reshape(L, C, H, W)
    alphas_out = None if alphas_flat is None else alphas_flat.reshape(L, H, W)
    return images, alphas_out


class PeekabooSegmenterPallas:
    """Minimal JAX re-implementation of PeekabooSegmenter's forward pass."""

    def __init__(self, image_hwc, num_labels, background_color=(0.0, 0.0, 0.0),
                 key=None, out_dtype=None):
        H, W, _ = image_hwc.shape
        self.height, self.width = H, W
        self.num_labels = num_labels
        self.out_dtype = out_dtype   # e.g. jnp.bfloat16 to halve image writeback traffic
        # torch `as_torch_image` -> CHW float
        self.foreground = jnp.transpose(image_hwc, (2, 0, 1)).astype(jnp.float32)
        # Background is always a flat color in the original module (default zeros).
        self.background_color = jnp.asarray(background_color, dtype=jnp.float32)
        # Deterministic "learnable image" parameters (raster-sigmoided representation).
        if key is None:
            key = jax.random.PRNGKey(0)
        self.alpha_logits = 0.1 * jax.random.normal(
            key, (num_labels, H, W), dtype=jnp.float32)

    def set_background_color(self, color):
        r, g, b = color
        assert 0 <= r <= 1 and 0 <= g <= 1 and 0 <= b <= 1
        self.background_color = jnp.asarray((r, g, b), dtype=jnp.float32)

    def forward(self, alphas=None, return_alphas=False):
        if alphas is None:
            images, alphas_out = peekaboo_blend(
                self.alpha_logits, self.foreground, self.background_color,
                apply_sigmoid=True, write_alphas=return_alphas,
                out_dtype=self.out_dtype)
        else:
            # Sigmoid-bypass path: alphas used directly; skip the redundant alphas
            # writeback entirely and hand the caller's array back (exact).
            alphas = alphas.astype(jnp.float32)
            images, _ = peekaboo_blend(
                alphas, self.foreground, self.background_color,
                apply_sigmoid=False, write_alphas=False, out_dtype=self.out_dtype)
            alphas_out = alphas
        if return_alphas:
            return images, alphas_out
        return images


if __name__ == "__main__":
    key = jax.random.PRNGKey(0)
    k_img, k_logit, k_alpha, k_img2 = jax.random.split(key, 4)

    # Case 1: 16x16 image, 3 labels (flattened spatial axis is a multiple of 128).
    H = W = 16
    L = 3
    image_hwc = jax.random.uniform(k_img, (H, W, 3), dtype=jnp.float32)  # [0,1] image
    seg = PeekabooSegmenterPallas(image_hwc, num_labels=L,
                                  background_color=(0.25, 0.5, 0.75), key=k_logit)

    # Path 1: alphas produced internally (self.alphas()), with alphas output.
    images, alphas = seg.forward(return_alphas=True)
    images, alphas = jax.block_until_ready((images, alphas))
    assert images.shape == (L, 3, H, W)
    assert alphas.shape == (L, H, W)

    # Reference check in plain JAX (matches blend_torch_images semantics).
    fg = seg.foreground
    bg = seg.background_color[:, None, None] * jnp.ones((3, H, W), jnp.float32)
    ref_alphas = jax.nn.sigmoid(seg.alpha_logits)
    ref_images = fg[None] * ref_alphas[:, None] + bg[None] * (1.0 - ref_alphas[:, None])
    assert jnp.allclose(images, ref_images, atol=1e-5, rtol=1e-5)
    assert jnp.allclose(alphas, ref_alphas, atol=1e-5, rtol=1e-5)

    # Path 1b: return_alphas=False -> kernel variant with no alphas writeback.
    images_only = jax.block_until_ready(seg.forward())
    assert jnp.allclose(images_only, ref_images, atol=1e-5, rtol=1e-5)

    # Path 2: alphas passed explicitly (sigmoid bypass, no alphas writeback -> exact).
    ext_alphas = jax.random.uniform(k_alpha, (L, H, W), dtype=jnp.float32)
    images2, alphas2 = seg.forward(alphas=ext_alphas, return_alphas=True)
    images2 = jax.block_until_ready(images2)
    ref2 = fg[None] * ext_alphas[:, None] + bg[None] * (1.0 - ext_alphas[:, None])
    assert jnp.allclose(images2, ref2, atol=1e-5, rtol=1e-5)
    assert jnp.array_equal(jax.block_until_ready(alphas2), ext_alphas)

    # Case 2: non-128-aligned spatial size exercises the lane-padding path.
    H2 = W2 = 10
    L2 = 2
    image2_hwc = jax.random.uniform(k_img2, (H2, W2, 3), dtype=jnp.float32)
    seg2 = PeekabooSegmenterPallas(image2_hwc, num_labels=L2,
                                   background_color=(0.0, 0.0, 0.0), key=k_logit)
    out2, a2 = seg2.forward(return_alphas=True)
    out2, a2 = jax.block_until_ready((out2, a2))
    fg2 = seg2.foreground
    ra2 = jax.nn.sigmoid(seg2.alpha_logits)
    ref_out2 = fg2[None] * ra2[:, None]                       # background is zeros
    assert out2.shape == (L2, 3, H2, W2)
    assert jnp.allclose(out2, ref_out2, atol=1e-5, rtol=1e-5)
    assert jnp.allclose(a2, ra2, atol=1e-5, rtol=1e-5)

    print("KERNEL_OK")
</pallas_src>

<mosaic_0001>
module attributes {stable_mosaic.version = 11 : i64} {
  func.func @_peekaboo_kernel(%arg0: i32, %arg1: memref<3x1xf32, #tpu.memory_space<vmem>>, %arg2: memref<3x256xf32, #tpu.memory_space<vmem>>, %arg3: memref<3x256xf32, #tpu.memory_space<vmem>>, %arg4: memref<9x256xf32, #tpu.memory_space<vmem>>, %arg5: memref<3x256xf32, #tpu.memory_space<vmem>>) attributes {dimension_semantics = [#tpu.dimension_semantics<parallel>], iteration_bounds = array<i64: 1>, scalar_prefetch = 0 : i64, scratch_operands = 0 : i64, tpu.core_type = #tpu.core_type<tc>, window_params = [{pipeline_mode = #tpu.pipeline_mode<synchronous>, transform_indices = @transform_0, window_bounds = array<i64: 3, 1>}, {transform_indices = @transform_1, window_bounds = array<i64: 3, 256>}, {transform_indices = @transform_2, window_bounds = array<i64: 3, 256>}, {transform_indices = @transform_3, window_bounds = array<i64: 9, 256>}, {transform_indices = @transform_4, window_bounds = array<i64: 3, 256>}]} {
    %c0 = arith.constant 0 : index
    %c0_0 = arith.constant 0 : index
    %0 = vector.load %arg2[%c0, %c0_0] : memref<3x256xf32, #tpu.memory_space<vmem>>, vector<3x256xf32>
    %1 = arith.negf %0 : vector<3x256xf32>
    %2 = math.exp %1 : vector<3x256xf32>
    %cst = arith.constant 1.000000e+00 : f32
    %3 = vector.broadcast %cst : f32 to vector<3x256xf32>
    %4 = arith.addf %3, %2 : vector<3x256xf32>
    %5 = arith.divf %3, %4 : vector<3x256xf32>
    %c0_1 = arith.constant 0 : index
    %c0_2 = arith.constant 0 : index
    %6 = vector.load %arg5[%c0_1, %c0_2] : memref<3x256xf32, #tpu.memory_space<vmem>>, vector<3x256xf32>
    tpu.vector_store %arg5[%c0_1, %c0_2], %5 {strides = array<i32>} : memref<3x256xf32, #tpu.memory_space<vmem>>, vector<3x256xf32>,
    %c0_3 = arith.constant 0 : index
    %c0_4 = arith.constant 0 : index
    %7 = vector.load %arg1[%c0_3, %c0_4] : memref<3x1xf32, #tpu.memory_space<vmem>>, vector<3x1xf32>
    %c0_5 = arith.constant 0 : index
    %c0_6 = arith.constant 0 : index
    %8 = vector.load %arg3[%c0_5, %c0_6] : memref<3x256xf32, #tpu.memory_space<vmem>>, vector<3x256xf32>
    %9 = vector.broadcast %7 : vector<3x1xf32> to vector<3x256xf32>
    %10 = arith.subf %8, %9 : vector<3x256xf32>
    %11 = vector.extract_strided_slice %5 {offsets = [0, 0], sizes = [1, 256], strides = [1, 1]} : vector<3x256xf32> to vector<1x256xf32>
    %12 = vector.broadcast %11 : vector<1x256xf32> to vector<3x256xf32>
    %13 = arith.mulf %12, %10 : vector<3x256xf32>
    %14 = vector.broadcast %7 : vector<3x1xf32> to vector<3x256xf32>
    %15 = arith.addf %14, %13 : vector<3x256xf32>
    %c0_7 = arith.constant 0 : index
    %c0_8 = arith.constant 0 : index
    %16 = vector.load %arg4[%c0_7, %c0_8] : memref<9x256xf32, #tpu.memory_space<vmem>>, vector<3x256xf32>
    tpu.vector_store %arg4[%c0_7, %c0_8], %15 {strides = array<i32>} : memref<9x256xf32, #tpu.memory_space<vmem>>, vector<3x256xf32>,
    %17 = vector.extract_strided_slice %5 {offsets = [1, 0], sizes = [1, 256], strides = [1, 1]} : vector<3x256xf32> to vector<1x256xf32>
    %18 = vector.broadcast %17 : vector<1x256xf32> to vector<3x256xf32>
    %19 = arith.mulf %18, %10 : vector<3x256xf32>
    %20 = vector.broadcast %7 : vector<3x1xf32> to vector<3x256xf32>
    %21 = arith.addf %20, %19 : vector<3x256xf32>
    %c3 = arith.constant 3 : index
    %c0_9 = arith.constant 0 : index
    %22 = vector.load %arg4[%c3, %c0_9] : memref<9x256xf32, #tpu.memory_space<vmem>>, vector<3x256xf32>
    tpu.vector_store %arg4[%c3, %c0_9], %21 {strides = array<i32>} : memref<9x256xf32, #tpu.memory_space<vmem>>, vector<3x256xf32>,
    %23 = vector.extract_strided_slice %5 {offsets = [2, 0], sizes = [1, 256], strides = [1, 1]} : vector<3x256xf32> to vector<1x256xf32>
    %24 = vector.broadcast %23 : vector<1x256xf32> to vector<3x256xf32>
    %25 = arith.mulf %24, %10 : vector<3x256xf32>
    %26 = vector.broadcast %7 : vector<3x1xf32> to vector<3x256xf32>
    %27 = arith.addf %26, %25 : vector<3x256xf32>
    %c6 = arith.constant 6 : index
    %c0_10 = arith.constant 0 : index
    %28 = vector.load %arg4[%c6, %c0_10] : memref<9x256xf32, #tpu.memory_space<vmem>>, vector<3x256xf32>
    tpu.vector_store %arg4[%c6, %c0_10], %27 {strides = array<i32>} : memref<9x256xf32, #tpu.memory_space<vmem>>, vector<3x256xf32>,
    return
  }
  func.func @transform_0(%arg0: i32) -> (i32, i32) {
    %c0_i32 = arith.constant 0 : i32
    %c0_i32_0 = arith.constant 0 : i32
    %c0_i32_1 = arith.constant 0 : i32
    return %c0_i32, %c0_i32_0 : i32, i32
  }
  func.func @transform_1(%arg0: i32) -> (i32, i32) {
    %c0_i32 = arith.constant 0 : i32
    %c0_i32_0 = arith.constant 0 : i32
    return %c0_i32, %arg0 : i32, i32
  }
  func.func @transform_2(%arg0: i32) -> (i32, i32) {
    %c0_i32 = arith.constant 0 : i32
    %c0_i32_0 = arith.constant 0 : i32
    return %c0_i32, %arg0 : i32, i32
  }
  func.func @transform_3(%arg0: i32) -> (i32, i32) {
    %c0_i32 = arith.constant 0 : i32
    %c0_i32_0 = arith.constant 0 : i32
    return %c0_i32, %arg0 : i32, i32
  }
  func.func @transform_4(%arg0: i32) -> (i32, i32) {
    %c0_i32 = arith.constant 0 : i32
    %c0_i32_0 = arith.constant 0 : i32
    return %c0_i32, %arg0 : i32, i32
  }
}

</mosaic_0001>

<bundles_post_ra>
// kernel: peekaboo_blend.1
= control target key start
LH: loop header
LB: loop body
LE: loop exit
PB: predicated region body
PF: predicated region fallthrough
CT: control target
= control target key end

     0   :  { %v146_v0 = vmov 0   ;;  %v34_v7 = vlaneseq  ;;  %v147_v8 = vmov 839922192   ;;  %s203_s0 = inlined_call_operand.vmem [shape: f32[3,1], index: 0, kind: input, shape index: {}]   ;;  %s204_s1 = inlined_call_operand.vmem [shape: f32[3,256], index: 1, kind: input, shape index: {}]   ;;  %s205_s4 = inlined_call_operand.vmem [shape: f32[3,256], index: 4, kind: output, shape index: {1}]   ;;  %s206_s2 = inlined_call_operand.vmem [shape: f32[3,256], index: 2, kind: input, shape index: {}]   ;;  %s207_s3 = inlined_call_operand.vmem [shape: f32[9,256], index: 3, kind: output, shape index: {0}]  }
   0x1   :  { %141 = vset.pattern.permute.xlu0 %v146_v0  ;;  %v24_v1 = vld [vmem:[%s203_s0] sm:$0x7]  ;;  %v32_v9 = vunpack.c.l.s4 %v147_v8 }
   0x2   :  { %v16_v2 = vld [vmem:[%s204_s1] sm:$0x77]  ;;  %28 = vperm.xlu0 %141, %v24_v1   ;;  %v35_v10 = vshrl.u32 %v34_v7, 7 }
   0x3   :  { %v138_v3 = vmul.f32 -1.442695, %v16_v2  ;;  %v33_v11 = vunpack.c.0.s8 %v32_v9  ;;  %v25_v24 = vld [vmem:[%s206_s2] sm:$0x77] }
   0x4   :  { %v43_v12 = vsub.s32 0, %v35_v10  ;;  %v70_v13 = vsub.s32 1, %v35_v10  ;;  %v100_v14 = vsub.s32 2, %v35_v10  ;;  %v47_v15 = vsub.s32 4, %v35_v10 }
   0x5   :  { %142 = vpow2.f32 %v138_v3  ;;  %v74_v16 = vsub.s32 5, %v35_v10  ;;  %v104_v17 = vsub.s32 6, %v35_v10  ;;  %v36_v18 = vsub.s32 %v33_v11, %v35_v10 }
   0xf   :  { %v143_v4 = vpop.eup %142 }
  0x10   :  { %v20_v5 = vadd.f32 1.0, %v143_v4 }
  0x12   :  { %144 = vrcp.f32 %v20_v5 }
  0x1c   :  { %v145_v6 = vpop.eup %144 }
  0x1d   :  { %23 = vst [vmem:[%s205_s4] sm:$0x77] %v145_v6  ;;  %v44_v19 = vrot.slane %v145_v6, %v43_v12  ;;  %v71_v20 = vrot.slane %v145_v6, %v70_v13  ;;  %v101_v21 = vrot.slane %v145_v6, %v100_v14  ;;  %v48_v22 = vrot.slane %v145_v6, %v47_v15 }
  0x1e   :  { %v75_v23 = vrot.slane %v145_v6, %v74_v16  ;;  %v105_v25 = vrot.slane %v145_v6, %v104_v17 }
  0x1f   :  { %v54_v27 = vrot.slane %v44_v19, %v43_v12  ;;  %v81_v28 = vrot.slane %v71_v20, %v70_v13  ;;  %v111_v29 = vrot.slane %v101_v21, %v100_v14  ;;  %v58_v31 = vrot.slane %v48_v22, %v43_v12 }
  0x20   :  { %v85_v32 = vrot.slane %v75_v23, %v70_v13  ;;  %v115_v34 = vrot.slane %v105_v25, %v100_v14 }
  0x81   :  { %v29_v26 = vpop.permute.xlu0 %28 }
  0x82   :  { %v37_v30 = vrot.slane %v29_v26, %v36_v18 }
  0x84   :  { %v39_v33 = vsub.f32 %v25_v24, %v37_v30 }
  0x86   :  { %v60_v35 = vcombine.high %v39_v33, %v39_v33  ;;  %v62_v36 = vmul.f32 %v54_v27, %v39_v33  ;;  %v86_v37 = vmul.f32 %v81_v28, %v39_v33  ;;  %v116_v38 = vmul.f32 %v111_v29, %v39_v33 }
  0x88   :  { %v63_v39 = vmul.f32 %v60_v35, %v58_v31  ;;  %v64_v40 = vadd.f32 %v62_v36, %v29_v26  ;;  %v87_v41 = vmul.f32 %v85_v32, %v60_v35  ;;  %v88_v42 = vadd.f32 %v86_v37, %v29_v26 }
  0x89   :  { %v117_v43 = vmul.f32 %v115_v34, %v60_v35  ;;  %v118_v44 = vadd.f32 %v116_v38, %v29_v26 }
  0x8a   :  { %v65_v45 = vadd.f32 %v63_v39, %v29_v26  ;;  %66 = vst [vmem:[%s207_s3] sm:$0x7] %v64_v40  ;;  %v89_v46 = vadd.f32 %v87_v41, %v29_v26  ;;  %v92_v47 = vrot.slane %v88_v42, 5 }
  0x8b   :  { %v119_v48 = vadd.f32 %v117_v43, %v29_v26  ;;  %v122_v49 = vrot.slane %v118_v44, 2 }
  0x8c   :  { %67 = vst [vmem:[%s207_s3 + $0x8] sm:$0x7] %v65_v45  ;;  %v93_v50 = vrot.slane %v89_v46, 5  ;;  %96 = vst [vmem:[%s207_s3] sm:$0x38] %v92_v47 }
  0x8d   :  { %v123_v51 = vrot.slane %v119_v48, 2  ;;  %126 = vst [vmem:[%s207_s3 + $0x10] ss:$-12 sps:$4 sm:$0xc1] %v122_v49  }
  0x8e   :  { %97 = vst [vmem:[%s207_s3 + $0x8] sm:$0x38] %v93_v50 }
  0x8f   :  { %127 = vst [vmem:[%s207_s3 + $0x18] ss:$-12 sps:$4 sm:$0xc1] %v123_v51  }

</bundles_post_ra>
